<compile_context>
chip_gen: v6e
topology: v6e:2x2x1
jax: 0.10.0
libtpu: 0.0.40
codegen_flags: <defaults>
</compile_context>

<pallas_src>
import functools

import jax
import jax.numpy as jnp
from jax.experimental import pallas as pl
from jax.experimental.pallas import tpu as pltpu

LANE = 128          # lane width
SUB = 8             # f32 sublane count
ROW_ALIGN = 32      # row-block granularity legal for f32/bf16/int8 tilings
MAX_ROW_BLK = 4096  # rows per tile (2 MiB f32 per stream per buffer)
NCORES = 2          # leading parallel grid axis (v7x megacore; serial elsewhere)


def _dice_partial_kernel(x_ref, t_ref, out_ref, acc_i, acc_st,
                         *, nblocks, valid_in_last):
    """Accumulate sum(s*t) and sum(s)+sum(t) into (8,128) partials per core."""
    blk_rows, lane = x_ref.shape
    c = pl.program_id(0)
    i = pl.program_id(1)
    steps = pl.num_programs(1)
    blk_idx = c * steps + i            # logical (unclamped) block index

    @pl.when(i == 0)
    def _init():
        acc_i[...] = jnp.zeros_like(acc_i)
        acc_st[...] = jnp.zeros_like(acc_st)

    def accumulate(mask_tail):
        x = x_ref[...].astype(jnp.float32)
        t = t_ref[...].astype(jnp.float32)
        # exp on the EUP slot; f32 divide is exact (recip + refinement).
        # TODO(synk): pl.reciprocal(..., approx=True) is a v7x knob (~1e-4 shift).
        s = 1.0 / (1.0 + jnp.exp(-x))
        prod = s * t
        st = s + t
        if mask_tail:                  # static: only traced for the tail block
            elem = (jax.lax.broadcasted_iota(jnp.int32, (blk_rows, lane), 0) * lane
                    + jax.lax.broadcasted_iota(jnp.int32, (blk_rows, lane), 1))
            keep = elem < valid_in_last
            prod = jnp.where(keep, prod, 0.0)
            st = jnp.where(keep, st, 0.0)
        # Tile-aligned reshape; sum over leading axis = pure vreg adds (no XLU).
        acc_i[...] += prod.reshape(blk_rows // SUB, SUB, lane).sum(axis=0)
        acc_st[...] += st.reshape(blk_rows // SUB, SUB, lane).sum(axis=0)

    if valid_in_last == blk_rows * lane:     # static: no ragged tail anywhere
        @pl.when(blk_idx < nblocks)          # skip clamped duplicate steps
        def _steady():
            accumulate(False)
    else:
        @pl.when(blk_idx < nblocks - 1)      # full tiles: no mask work
        def _steady():
            accumulate(False)

        @pl.when(blk_idx == nblocks - 1)     # last real tile: masked
        def _tail():
            accumulate(True)

    @pl.when(i == steps - 1)
    def _finalize():
        out_ref[0, 0, :, :] = acc_i[...]
        out_ref[0, 1, :, :] = acc_st[...]


@functools.partial(jax.jit, static_argnames=("row_blk_cap",))
def dice_loss(inputs, targets, smooth=1.0, row_blk_cap=MAX_ROW_BLK):
    """Pallas DiceLoss. inputs/targets: any matching-size shape (e.g. NCHW)."""
    x = jnp.ravel(inputs)
    t = jnp.ravel(targets)
    n = x.shape[0]
    smooth = jnp.asarray(smooth, jnp.float32)
    if n == 0:
        # Empty input: dice == smooth/smooth == 1, loss == 0.
        return jnp.float32(0.0)

    # Keep floating logits in native dtype (cast in-kernel); bool targets pass
    # through as int8 (1 byte/elem of HBM traffic) instead of being blown up
    # to f32 in HBM.
    if not jnp.issubdtype(x.dtype, jnp.floating):
        x = x.astype(jnp.float32)
    if t.dtype == jnp.bool_:
        t = t.astype(jnp.int8)
    elif not (jnp.issubdtype(t.dtype, jnp.floating)
              or t.dtype in (jnp.int8, jnp.int32)):
        t = t.astype(jnp.float32)

    # ---- geometry ----------------------------------------------------------
    pad = (-n) % LANE                        # flat -> lane multiple
    rows = (n + pad) // LANE
    if rows < ROW_ALIGN:                     # tiny input: pad up to one legal block
        pad += (ROW_ALIGN - rows) * LANE
        rows = ROW_ALIGN
    if pad:
        # TODO(synk): ragged/tiny sizes still pay one pad copy; pad values are
        # ignored by the in-kernel tail mask (no sentinel), only the copy cost remains.
        x = jnp.pad(x, (0, pad))
        t = jnp.pad(t, (0, pad))
    x2 = x.reshape(rows, LANE)
    t2 = t.reshape(rows, LANE)

    row_blk = min(rows, int(row_blk_cap))
    row_blk = max(ROW_ALIGN, (row_blk // ROW_ALIGN) * ROW_ALIGN)
    nblocks = pl.cdiv(rows, row_blk)
    ncores = NCORES if nblocks >= NCORES else 1
    steps = pl.cdiv(nblocks, ncores)
    blk_elems = row_blk * LANE
    valid_in_last = n - (nblocks - 1) * blk_elems   # true elements in last block

    def in_idx(c, i):
        # Clamp so over-covering steps of the core split never point past the
        # array; duplicates are skipped inside the kernel via pl.when.
        return (jnp.minimum(c * steps + i, nblocks - 1), 0)

    kernel = functools.partial(_dice_partial_kernel,
                               nblocks=nblocks, valid_in_last=valid_in_last)

    partials = pl.pallas_call(
        kernel,
        out_shape=jax.ShapeDtypeStruct((ncores, 2, SUB, LANE), jnp.float32),
        grid_spec=pltpu.PrefetchScalarGridSpec(
            num_scalar_prefetch=0,
            grid=(ncores, steps),
            in_specs=[pl.BlockSpec((row_blk, LANE), in_idx),
                      pl.BlockSpec((row_blk, LANE), in_idx)],
            out_specs=pl.BlockSpec((1, 2, SUB, LANE), lambda c, i: (c, 0, 0, 0)),
            scratch_shapes=[pltpu.VMEM((SUB, LANE), jnp.float32),
                            pltpu.VMEM((SUB, LANE), jnp.float32)],
        ),
        compiler_params=pltpu.CompilerParams(
            dimension_semantics=("parallel", "arbitrary"),
            vmem_limit_bytes=32 * 1024 * 1024),
        cost_estimate=pl.CostEstimate(
            flops=8 * n,
            transcendentals=n,
            bytes_accessed=int(x2.size) * x2.dtype.itemsize
                           + int(t2.size) * t2.dtype.itemsize
                           + ncores * 2 * SUB * LANE * 4),
    )(x2, t2)

    inter = jnp.sum(partials[:, 0, :, :])
    st_sum = jnp.sum(partials[:, 1, :, :])
    dice = (2.0 * inter + smooth) / (st_sum + smooth)
    return (1.0 - dice).astype(jnp.float32)


def _dice_ref(inputs, targets, smooth=1.0):
    s = jax.nn.sigmoid(inputs.astype(jnp.float32)).ravel()
    t = targets.astype(jnp.float32).ravel()
    inter = jnp.sum(s * t)
    dice = (2.0 * inter + smooth) / (jnp.sum(s) + jnp.sum(t) + smooth)
    return 1.0 - dice


if __name__ == "__main__":
    key = jax.random.PRNGKey(0)

    # Primary small test: NCHW batch=2, channels=4, spatial=16x16 (single block,
    # tail mask covers the rows padded up to one legal 32x128 block).
    k1, k2 = jax.random.split(key)
    x = jax.random.normal(k1, (2, 4, 16, 16), dtype=jnp.float32)
    tgt = (jax.random.uniform(k2, (2, 4, 16, 16)) > 0.5).astype(jnp.float32)
    loss = jax.block_until_ready(dice_loss(x, tgt, smooth=1.0))
    ref = _dice_ref(x, tgt, smooth=1.0)
    assert jnp.allclose(loss, ref, atol=2e-5, rtol=2e-5), (loss, ref)

    # Ragged numel (not a multiple of 128) + bool targets (int8 pass-through).
    k3, k4 = jax.random.split(k1)
    x2 = jax.random.normal(k3, (1, 3, 21, 23), dtype=jnp.float32)
    t2 = jax.random.uniform(k4, (1, 3, 21, 23)) > 0.5        # bool targets
    loss2 = jax.block_until_ready(dice_loss(x2, t2, smooth=1.0))
    ref2 = _dice_ref(x2, t2, smooth=1.0)
    assert jnp.allclose(loss2, ref2, atol=2e-5, rtol=2e-5), (loss2, ref2)

    # Larger input, default block (single big tile, zero-copy path).
    k5, k6 = jax.random.split(k2)
    x3 = jax.random.normal(k5, (2, 4, 192, 192), dtype=jnp.float32)
    t3 = (jax.random.uniform(k6, (2, 4, 192, 192)) > 0.5).astype(jnp.float32)
    loss3 = jax.block_until_ready(dice_loss(x3, t3, smooth=1.0))
    ref3 = _dice_ref(x3, t3, smooth=1.0)
    assert jnp.allclose(loss3, ref3, atol=1e-4, rtol=1e-4), (loss3, ref3)

    # Same data with a small block cap: exercises the multi-step grid, the
    # 2-way core split, the clamped duplicate step and the in-kernel tail mask.
    loss3b = jax.block_until_ready(dice_loss(x3, t3, smooth=1.0, row_blk_cap=352))
    assert jnp.allclose(loss3b, ref3, atol=1e-4, rtol=1e-4), (loss3b, ref3)

    print("KERNEL_OK")
</pallas_src>

<mosaic_0001>
module attributes {stable_mosaic.version = 11 : i64} {
  func.func @_dice_partial_kernel(%arg0: i32, %arg1: i32, %arg2: memref<32x128xf32, #tpu.memory_space<vmem>>, %arg3: memref<32x128xf32, #tpu.memory_space<vmem>>, %arg4: memref<1x2x8x128xf32, #tpu.memory_space<vmem>>, %arg5: memref<8x128xf32, #tpu.memory_space<vmem>>, %arg6: memref<8x128xf32, #tpu.memory_space<vmem>>) attributes {dimension_semantics = [#tpu.dimension_semantics<parallel>, #tpu.dimension_semantics<arbitrary>], iteration_bounds = array<i64: 1, 1>, scalar_prefetch = 0 : i64, scratch_operands = 2 : i64, tpu.core_type = #tpu.core_type<tc>, window_params = [{transform_indices = @transform_0, window_bounds = array<i64: 32, 128>}, {transform_indices = @transform_1, window_bounds = array<i64: 32, 128>}, {transform_indices = @transform_2, window_bounds = array<i64: 1, 2, 8, 128>}]} {
    %c1_i32 = arith.constant 1 : i32
    %0 = arith.muli %arg0, %c1_i32 : i32
    %1 = arith.addi %0, %arg1 : i32
    %c0_i32 = arith.constant 0 : i32
    %2 = arith.cmpi eq, %arg1, %c0_i32 : i32
    %3 = arith.extui %2 : i1 to i32
    %c0_i32_0 = arith.constant 0 : i32
    %4 = arith.cmpi ne, %3, %c0_i32_0 : i32
    scf.if %4 {
      %cst = arith.constant 0.000000e+00 : f32
      %14 = vector.broadcast %cst : f32 to vector<8x128xf32>
      %c0 = arith.constant 0 : index
      %c0_7 = arith.constant 0 : index
      %15 = vector.load %arg5[%c0, %c0_7] : memref<8x128xf32, #tpu.memory_space<vmem>>, vector<8x128xf32>
      tpu.vector_store %arg5[%c0, %c0_7], %14 {strides = array<i32>} : memref<8x128xf32, #tpu.memory_space<vmem>>, vector<8x128xf32>,
      %cst_8 = arith.constant 0.000000e+00 : f32
      %16 = vector.broadcast %cst_8 : f32 to vector<8x128xf32>
      %c0_9 = arith.constant 0 : index
      %c0_10 = arith.constant 0 : index
      %17 = vector.load %arg6[%c0_9, %c0_10] : memref<8x128xf32, #tpu.memory_space<vmem>>, vector<8x128xf32>
      tpu.vector_store %arg6[%c0_9, %c0_10], %16 {strides = array<i32>} : memref<8x128xf32, #tpu.memory_space<vmem>>, vector<8x128xf32>,
    } else {
    }
    %c0_i32_1 = arith.constant 0 : i32
    %5 = arith.cmpi slt, %1, %c0_i32_1 : i32
    %6 = arith.extui %5 : i1 to i32
    %c0_i32_2 = arith.constant 0 : i32
    %7 = arith.cmpi ne, %6, %c0_i32_2 : i32
    scf.if %7 {
      %c0 = arith.constant 0 : index
      %c0_7 = arith.constant 0 : index
      %14 = vector.load %arg2[%c0, %c0_7] : memref<32x128xf32, #tpu.memory_space<vmem>>, vector<32x128xf32>
      %c0_8 = arith.constant 0 : index
      %c0_9 = arith.constant 0 : index
      %15 = vector.load %arg3[%c0_8, %c0_9] : memref<32x128xf32, #tpu.memory_space<vmem>>, vector<32x128xf32>
      %cst = arith.constant 0.000000e+00 : f32
      %16 = vector.broadcast %cst : f32 to vector<32x128xf32>
      %17 = arith.subf %16, %14 : vector<32x128xf32>
      %18 = math.exp %17 : vector<32x128xf32>
      %cst_10 = arith.constant 1.000000e+00 : f32
      %19 = vector.broadcast %cst_10 : f32 to vector<32x128xf32>
      %20 = arith.addf %19, %18 : vector<32x128xf32>
      %cst_11 = arith.constant 1.000000e+00 : f32
      %21 = vector.broadcast %cst_11 : f32 to vector<32x128xf32>
      %22 = arith.divf %21, %20 : vector<32x128xf32>
      %23 = arith.mulf %22, %15 : vector<32x128xf32>
      %24 = arith.addf %22, %15 : vector<32x128xf32>
      %c0_12 = arith.constant 0 : index
      %c0_13 = arith.constant 0 : index
      %25 = vector.load %arg5[%c0_12, %c0_13] : memref<8x128xf32, #tpu.memory_space<vmem>>, vector<8x128xf32>
      %26 = vector.shape_cast %23 : vector<32x128xf32> to vector<4x8x128xf32>
      %cst_14 = arith.constant dense<0.000000e+00> : vector<8x128xf32>
      %27 = vector.multi_reduction <add>, %26, %cst_14 [0] : vector<4x8x128xf32> to vector<8x128xf32>
      %28 = arith.addf %25, %27 : vector<8x128xf32>
      %c0_15 = arith.constant 0 : index
      %c0_16 = arith.constant 0 : index
      %29 = vector.load %arg5[%c0_15, %c0_16] : memref<8x128xf32, #tpu.memory_space<vmem>>, vector<8x128xf32>
      tpu.vector_store %arg5[%c0_15, %c0_16], %28 {strides = array<i32>} : memref<8x128xf32, #tpu.memory_space<vmem>>, vector<8x128xf32>,
      %c0_17 = arith.constant 0 : index
      %c0_18 = arith.constant 0 : index
      %30 = vector.load %arg6[%c0_17, %c0_18] : memref<8x128xf32, #tpu.memory_space<vmem>>, vector<8x128xf32>
      %31 = vector.shape_cast %24 : vector<32x128xf32> to vector<4x8x128xf32>
      %cst_19 = arith.constant dense<0.000000e+00> : vector<8x128xf32>
      %32 = vector.multi_reduction <add>, %31, %cst_19 [0] : vector<4x8x128xf32> to vector<8x128xf32>
      %33 = arith.addf %30, %32 : vector<8x128xf32>
      %c0_20 = arith.constant 0 : index
      %c0_21 = arith.constant 0 : index
      %34 = vector.load %arg6[%c0_20, %c0_21] : memref<8x128xf32, #tpu.memory_space<vmem>>, vector<8x128xf32>
      tpu.vector_store %arg6[%c0_20, %c0_21], %33 {strides = array<i32>} : memref<8x128xf32, #tpu.memory_space<vmem>>, vector<8x128xf32>,
    } else {
    }
    %c0_i32_3 = arith.constant 0 : i32
    %8 = arith.cmpi eq, %1, %c0_i32_3 : i32
    %9 = arith.extui %8 : i1 to i32
    %c0_i32_4 = arith.constant 0 : i32
    %10 = arith.cmpi ne, %9, %c0_i32_4 : i32
    scf.if %10 {
      %c0 = arith.constant 0 : index
      %c0_7 = arith.constant 0 : index
      %14 = vector.load %arg2[%c0, %c0_7] : memref<32x128xf32, #tpu.memory_space<vmem>>, vector<32x128xf32>
      %c0_8 = arith.constant 0 : index
      %c0_9 = arith.constant 0 : index
      %15 = vector.load %arg3[%c0_8, %c0_9] : memref<32x128xf32, #tpu.memory_space<vmem>>, vector<32x128xf32>
      %cst = arith.constant 0.000000e+00 : f32
      %16 = vector.broadcast %cst : f32 to vector<32x128xf32>
      %17 = arith.subf %16, %14 : vector<32x128xf32>
      %18 = math.exp %17 : vector<32x128xf32>
      %cst_10 = arith.constant 1.000000e+00 : f32
      %19 = vector.broadcast %cst_10 : f32 to vector<32x128xf32>
      %20 = arith.addf %19, %18 : vector<32x128xf32>
      %cst_11 = arith.constant 1.000000e+00 : f32
      %21 = vector.broadcast %cst_11 : f32 to vector<32x128xf32>
      %22 = arith.divf %21, %20 : vector<32x128xf32>
      %23 = arith.mulf %22, %15 : vector<32x128xf32>
      %24 = arith.addf %22, %15 : vector<32x128xf32>
      %25 = tpu.iota {dimensions = array<i32: 0>} : vector<32x128xi32>
      %c128_i32 = arith.constant 128 : i32
      %26 = vector.broadcast %c128_i32 : i32 to vector<32x128xi32>
      %27 = arith.muli %25, %26 : vector<32x128xi32>
      %28 = tpu.iota {dimensions = array<i32: 1>} : vector<32x128xi32>
      %29 = arith.addi %27, %28 : vector<32x128xi32>
      %c2048_i32 = arith.constant 2048 : i32
      %30 = vector.broadcast %c2048_i32 : i32 to vector<32x128xi32>
      %31 = arith.cmpi slt, %29, %30 : vector<32x128xi32>
      %cst_12 = arith.constant 0.000000e+00 : f32
      %32 = vector.broadcast %cst_12 : f32 to vector<32x128xf32>
      %33 = arith.select %31, %23, %32 : vector<32x128xi1>, vector<32x128xf32>
      %cst_13 = arith.constant 0.000000e+00 : f32
      %34 = vector.broadcast %cst_13 : f32 to vector<32x128xf32>
      %35 = arith.select %31, %24, %34 : vector<32x128xi1>, vector<32x128xf32>
      %c0_14 = arith.constant 0 : index
      %c0_15 = arith.constant 0 : index
      %36 = vector.load %arg5[%c0_14, %c0_15] : memref<8x128xf32, #tpu.memory_space<vmem>>, vector<8x128xf32>
      %37 = vector.shape_cast %33 : vector<32x128xf32> to vector<4x8x128xf32>
      %cst_16 = arith.constant dense<0.000000e+00> : vector<8x128xf32>
      %38 = vector.multi_reduction <add>, %37, %cst_16 [0] : vector<4x8x128xf32> to vector<8x128xf32>
      %39 = arith.addf %36, %38 : vector<8x128xf32>
      %c0_17 = arith.constant 0 : index
      %c0_18 = arith.constant 0 : index
      %40 = vector.load %arg5[%c0_17, %c0_18] : memref<8x128xf32, #tpu.memory_space<vmem>>, vector<8x128xf32>
      tpu.vector_store %arg5[%c0_17, %c0_18], %39 {strides = array<i32>} : memref<8x128xf32, #tpu.memory_space<vmem>>, vector<8x128xf32>,
      %c0_19 = arith.constant 0 : index
      %c0_20 = arith.constant 0 : index
      %41 = vector.load %arg6[%c0_19, %c0_20] : memref<8x128xf32, #tpu.memory_space<vmem>>, vector<8x128xf32>
      %42 = vector.shape_cast %35 : vector<32x128xf32> to vector<4x8x128xf32>
      %cst_21 = arith.constant dense<0.000000e+00> : vector<8x128xf32>
      %43 = vector.multi_reduction <add>, %42, %cst_21 [0] : vector<4x8x128xf32> to vector<8x128xf32>
      %44 = arith.addf %41, %43 : vector<8x128xf32>
      %c0_22 = arith.constant 0 : index
      %c0_23 = arith.constant 0 : index
      %45 = vector.load %arg6[%c0_22, %c0_23] : memref<8x128xf32, #tpu.memory_space<vmem>>, vector<8x128xf32>
      tpu.vector_store %arg6[%c0_22, %c0_23], %44 {strides = array<i32>} : memref<8x128xf32, #tpu.memory_space<vmem>>, vector<8x128xf32>,
    } else {
    }
    %c0_i32_5 = arith.constant 0 : i32
    %11 = arith.cmpi eq, %arg1, %c0_i32_5 : i32
    %12 = arith.extui %11 : i1 to i32
    %c0_i32_6 = arith.constant 0 : i32
    %13 = arith.cmpi ne, %12, %c0_i32_6 : i32
    scf.if %13 {
      %c0 = arith.constant 0 : index
      %c0_7 = arith.constant 0 : index
      %14 = vector.load %arg5[%c0, %c0_7] : memref<8x128xf32, #tpu.memory_space<vmem>>, vector<8x128xf32>
      %c0_8 = arith.constant 0 : index
      %c0_9 = arith.constant 0 : index
      %c0_10 = arith.constant 0 : index
      %c0_11 = arith.constant 0 : index
      %15 = vector.load %arg4[%c0_8, %c0_9, %c0_10, %c0_11] : memref<1x2x8x128xf32, #tpu.memory_space<vmem>>, vector<1x1x8x128xf32>
      %16 = vector.shape_cast %15 : vector<1x1x8x128xf32> to vector<8x128xf32>
      %17 = vector.shape_cast %14 : vector<8x128xf32> to vector<1x1x8x128xf32>
      tpu.vector_store %arg4[%c0_8, %c0_9, %c0_10, %c0_11], %17 {strides = array<i32>} : memref<1x2x8x128xf32, #tpu.memory_space<vmem>>, vector<1x1x8x128xf32>,
      %c0_12 = arith.constant 0 : index
      %c0_13 = arith.constant 0 : index
      %18 = vector.load %arg6[%c0_12, %c0_13] : memref<8x128xf32, #tpu.memory_space<vmem>>, vector<8x128xf32>
      %c0_14 = arith.constant 0 : index
      %c1 = arith.constant 1 : index
      %c0_15 = arith.constant 0 : index
      %c0_16 = arith.constant 0 : index
      %19 = vector.load %arg4[%c0_14, %c1, %c0_15, %c0_16] : memref<1x2x8x128xf32, #tpu.memory_space<vmem>>, vector<1x1x8x128xf32>
      %20 = vector.shape_cast %19 : vector<1x1x8x128xf32> to vector<8x128xf32>
      %21 = vector.shape_cast %18 : vector<8x128xf32> to vector<1x1x8x128xf32>
      tpu.vector_store %arg4[%c0_14, %c1, %c0_15, %c0_16], %21 {strides = array<i32>} : memref<1x2x8x128xf32, #tpu.memory_space<vmem>>, vector<1x1x8x128xf32>,
    } else {
    }
    return
  }
  func.func @transform_0(%arg0: i32, %arg1: i32) -> (i32, i32) {
    %c1_i32 = arith.constant 1 : i32
    %0 = arith.muli %arg0, %c1_i32 : i32
    %1 = arith.addi %0, %arg1 : i32
    %c0_i32 = arith.constant 0 : i32
    %2 = arith.minsi %1, %c0_i32 : i32
    %c0_i32_0 = arith.constant 0 : i32
    %c0_i32_1 = arith.constant 0 : i32
    return %2, %c0_i32_0 : i32, i32
  }
  func.func @transform_1(%arg0: i32, %arg1: i32) -> (i32, i32) {
    %c1_i32 = arith.constant 1 : i32
    %0 = arith.muli %arg0, %c1_i32 : i32
    %1 = arith.addi %0, %arg1 : i32
    %c0_i32 = arith.constant 0 : i32
    %2 = arith.minsi %1, %c0_i32 : i32
    %c0_i32_0 = arith.constant 0 : i32
    %c0_i32_1 = arith.constant 0 : i32
    return %2, %c0_i32_0 : i32, i32
  }
  func.func @transform_2(%arg0: i32, %arg1: i32) -> (i32, i32, i32, i32) {
    %c0_i32 = arith.constant 0 : i32
    %c0_i32_0 = arith.constant 0 : i32
    %c0_i32_1 = arith.constant 0 : i32
    %c0_i32_2 = arith.constant 0 : i32
    return %arg0, %c0_i32, %c0_i32_0, %c0_i32_1 : i32, i32, i32, i32
  }
}

</mosaic_0001>

<bundles_post_ra>
// kernel: dice_loss.1
= control target key start
LH: loop header
LB: loop body
LE: loop exit
PB: predicated region body
PF: predicated region fallthrough
CT: control target
= control target key end

     0   :  { %v182_v12 = vlaneseq  ;;  %s309_s0 = inlined_call_operand.vmem [shape: f32[32,128], index: 0, kind: input, shape index: {}]   ;;  %s310_s1 = inlined_call_operand.vmem [shape: f32[32,128], index: 1, kind: input, shape index: {}]   ;;  %s311_s2 = inlined_call_operand.vmem [shape: f32[1,2,8,128], index: 2, kind: output, shape index: {}]  }
   0x1   :  { %v142_v0 = vld [vmem:[%s309_s0] sm:$0xff]  ;;  %v143_v1 = vld [vmem:[%s309_s0 + $0x8] sm:$0xff]  ;;  %v144_v2 = vld [vmem:[%s309_s0 + $0x10] sm:$0xff] }
   0x2   :  { %v145_v3 = vld [vmem:[%s309_s0 + $0x18] sm:$0xff]  ;;  %v150_v4 = vsub.f32 0.0, %v142_v0  ;;  %v151_v5 = vsub.f32 0.0, %v143_v1  ;;  %v152_v6 = vsub.f32 0.0, %v144_v2  ;;  %v183_v16 = vshrl.u32 %v182_v12, 7  ;;  %v146_v32 = vld [vmem:[%s310_s1] sm:$0xff] }
   0x3   :  { %v153_v7 = vsub.f32 0.0, %v145_v3  ;;  %v192_v26 = vand.u32 127, %v182_v12  ;;  %v147_v35 = vld [vmem:[%s310_s1 + $0x8] sm:$0xff]  ;;  %v148_v37 = vld [vmem:[%s310_s1 + $0x10] sm:$0xff]  ;;  %v149_v39 = vld [vmem:[%s310_s1 + $0x18] sm:$0xff] }
   0x4   :  { %v154_v8 = vmul.f32 1.442695, %v150_v4  ;;  %v156_v9 = vmul.f32 1.442695, %v151_v5  ;;  %v158_v10 = vmul.f32 1.442695, %v152_v6 }
   0x5   :  { %v160_v11 = vmul.f32 1.442695, %v153_v7  ;;  %v184_v22 = vadd.s32 8, %v183_v16  ;;  %v185_v23 = vadd.s32 16, %v183_v16  ;;  %v186_v24 = vadd.s32 24, %v183_v16 }
   0x6   :  { %246 = vpow2.f32 %v154_v8  ;;  %v187_v25 = vmul.u32 128, %v183_v16 }
   0x7   :  { %248 = vpow2.f32 %v156_v9  ;;  %v188_v27 = vmul.u32 128, %v184_v22  ;;  %v189_v28 = vmul.u32 128, %v185_v23 }
   0x8   :  { %250 = vpow2.f32 %v158_v10  ;;  %v190_v29 = vmul.u32 128, %v186_v24  ;;  %v193_v30 = vadd.s32 %v192_v26, %v187_v25 }
   0x9   :  { %252 = vpow2.f32 %v160_v11  ;;  %v194_v31 = vadd.s32 %v192_v26, %v188_v27  ;;  %v195_v33 = vadd.s32 %v192_v26, %v189_v28 }
   0xa   :  { %v196_v34 = vadd.s32 %v192_v26, %v190_v29  ;;  %vm197_vm0 = vcmp.lt.s32.totalorder %v193_v30, 2048 }
   0xb   :  { %vm198_vm1 = vcmp.lt.s32.totalorder %v194_v31, 2048  ;;  %vm199_vm2 = vcmp.lt.s32.totalorder %v195_v33, 2048 }
   0xc   :  { %vm200_vm3 = vcmp.lt.s32.totalorder %v196_v34, 2048 }
  0x13   :  { %v247_v13 = vpop.eup %246 }
  0x14   :  { %v249_v14 = vpop.eup %248  ;;  %v162_v15 = vadd.f32 1.0, %v247_v13 }
  0x15   :  { %v251_v17 = vpop.eup %250  ;;  %v163_v18 = vadd.f32 1.0, %v249_v14 }
  0x16   :  { %v253_v19 = vpop.eup %252  ;;  %v164_v20 = vadd.f32 1.0, %v251_v17  ;;  %254 = vrcp.f32 %v162_v15 }
  0x17   :  { %v165_v21 = vadd.f32 1.0, %v253_v19  ;;  %256 = vrcp.f32 %v163_v18 }
  0x18   :  { %258 = vrcp.f32 %v164_v20 }
  0x19   :  { %260 = vrcp.f32 %v165_v21 }
  0x23   :  { %v255_v36 = vpop.eup %254 }
  0x24   :  { %v257_v38 = vpop.eup %256  ;;  %v174_v40 = vmul.f32 %v255_v36, %v146_v32  ;;  %v178_v41 = vadd.f32 %v255_v36, %v146_v32 }
  0x25   :  { %v259_v42 = vpop.eup %258  ;;  %v175_v43 = vmul.f32 %v257_v38, %v147_v35  ;;  %v179_v44 = vadd.f32 %v257_v38, %v147_v35 }
  0x26   :  { %v261_v45 = vpop.eup %260  ;;  %v176_v46 = vmul.f32 %v259_v42, %v148_v37  ;;  %v201_v47 = vsel %vm197_vm0, %v174_v40, 0.0  ;;  %v180_v48 = vadd.f32 %v259_v42, %v148_v37  ;;  %v205_v49 = vsel %vm197_vm0, %v178_v41, 0.0 }
  0x27   :  { %v177_v50 = vmul.f32 %v261_v45, %v149_v39  ;;  %v202_v51 = vsel %vm198_vm1, %v175_v43, 0.0  ;;  %v181_v52 = vadd.f32 %v261_v45, %v149_v39  ;;  %v206_v53 = vsel %vm198_vm1, %v179_v44, 0.0 }
  0x28   :  { %v203_v54 = vsel %vm199_vm2, %v176_v46, 0.0  ;;  %v210_v55 = vadd.f32 %v202_v51, %v201_v47  ;;  %v207_v56 = vsel %vm199_vm2, %v180_v48, 0.0  ;;  %v216_v57 = vadd.f32 %v206_v53, %v205_v49 }
  0x29   :  { %v204_v58 = vsel %vm200_vm3, %v177_v50, 0.0  ;;  %v208_v59 = vsel %vm200_vm3, %v181_v52, 0.0 }
  0x2a   :  { %v211_v60 = vadd.f32 %v210_v55, %v203_v54  ;;  %v217_v61 = vadd.f32 %v216_v57, %v207_v56 }
  0x2c   :  { %v212_v62 = vadd.f32 %v211_v60, %v204_v58  ;;  %v218_v63 = vadd.f32 %v217_v61, %v208_v59 }
  0x2e   :  { %225 = vst [vmem:[%s311_s2] sm:$0xff] %v212_v62  ;;  %245 = vst [vmem:[%s311_s2 + $0x8] sm:$0xff] %v218_v63 }

</bundles_post_ra>
